<compile_context>
chip_gen: v6e
topology: v6e:2x2x1
jax: 0.10.0
libtpu: 0.0.40
codegen_flags: <defaults>
</compile_context>

<pallas_src>
import numpy as np
import jax
import jax.numpy as jnp
from jax.experimental import pallas as pl
from jax.experimental.pallas import tpu as pltpu


_LANE = 128
# Per-tile VMEM target.  4 MiB x (2 operands x double-buffer) = 16 MiB, which
# fits every generation's scoped-VMEM budget (and v7x's 64 MiB physical VMEM)
# while amortizing the ~0.35 us per-grid-step overhead even at v7x's 3.2 TB/s.
_TARGET_TILE_BYTES = 4 * 1024 * 1024


def _copy_kernel(x_ref, o_ref):
    # Pure identity copy of a lane-dense 2D tile.  No relayout, no compute.
    o_ref[...] = x_ref[...]


def _sublane_multiple(dtype) -> int:
    # Minimum sublane tile: 8 rows of 32-bit -> 8 (f32), 16 (bf16), 32 (i8/fp8).
    itemsize = jnp.dtype(dtype).itemsize
    return max(8, 32 // max(1, itemsize))


def merge_last_dims(x: jax.Array, ndims: int = 1, *, force_pallas_copy: bool = False) -> jax.Array:
    """Pallas equivalent of MergeLastDims(ndims)(x)."""
    shape = x.shape
    assert 1 <= ndims <= len(shape), "ndims must be in [1, x.ndim]"

    merged = int(np.prod(shape[-ndims:]))
    lead = tuple(shape[:-ndims])
    out_shape = lead + (merged,)

    # --- Standalone fast path: a free metadata reshape moves 0 bytes. -------
    if not force_pallas_copy or x.size == 0:
        return jnp.reshape(x, out_shape)

    # --- Pallas identity-copy path (for fusion / demonstration). ------------
    itemsize = jnp.dtype(x.dtype).itemsize
    sub = _sublane_multiple(x.dtype)
    total = int(x.size)

    # Pick a lane width W: a multiple of 128 that divides `total`, capped so
    # that even a minimum-height (sub x W) block stays within the tile budget.
    max_w = max(_LANE, ((_TARGET_TILE_BYTES // (sub * itemsize)) // _LANE) * _LANE)
    W = 0
    w = min(max_w, (total // _LANE) * _LANE)
    while w >= _LANE:
        if total % w == 0:
            W = w
            break
        w -= _LANE

    if W > 0:
        rows, cols = total // W, W
    else:
        # total not divisible by 128: fall back to the (prod(lead), merged)
        # view; full-extent blocks satisfy the (8,128) rule for odd sizes.
        rows, cols = max(1, total // merged), merged

    x2 = jnp.reshape(x, (rows, cols))  # free metadata reshape in the wrapper

    # Row block: as many rows as fit the budget, a multiple of `sub`, or the
    # full row extent.  cols is always the full width -> lane-dense out_spec,
    # 1-D grid, one contiguous DMA per step.
    row_budget = max(1, _TARGET_TILE_BYTES // (cols * itemsize))
    if rows <= row_budget:
        block_rows = rows
    else:
        block_rows = max(sub, (row_budget // sub) * sub)
    block_cols = cols

    # 2 operands x double-buffering = 4 VMEM buffers; derive the limit from the
    # actual tile, clamp to v7x's 64 MiB physical VMEM per TensorCore.
    tile_bytes = block_rows * block_cols * itemsize
    vmem_limit = int(min(64 * 1024 * 1024,
                         max(16 * 1024 * 1024, 4 * tile_bytes + 4 * 1024 * 1024)))

    grid = (pl.cdiv(rows, block_rows),)

    y2 = pl.pallas_call(
        _copy_kernel,
        out_shape=jax.ShapeDtypeStruct((rows, cols), x.dtype),
        grid=grid,
        in_specs=[pl.BlockSpec((block_rows, block_cols), lambda i: (i, 0))],
        out_specs=pl.BlockSpec((block_rows, block_cols), lambda i: (i, 0)),
        compiler_params=pltpu.CompilerParams(
            # Single "parallel" axis -> sharded across both TensorCores on v7x;
            # a no-op on single-TC v5e/v6e.
            dimension_semantics=("parallel",),
            vmem_limit_bytes=vmem_limit,
        ),
        cost_estimate=pl.CostEstimate(
            flops=0, transcendentals=0, bytes_accessed=2 * total * itemsize,
        ),
    )(x2)

    # Free metadata reshape back to the module's output shape.
    return jnp.reshape(y2, out_shape)


if __name__ == "__main__":
    key = jax.random.PRNGKey(0)

    # 1) NCHW-style input, merge last two dims (ndims=2): (2,4,16,16) -> (2,4,256).
    x = jax.random.normal(key, (2, 4, 16, 16), dtype=jnp.float32)
    y_ref = jnp.reshape(x, (2, 4, 256))
    # Standalone fast path (free reshape).
    y_fast = jax.block_until_ready(merge_last_dims(x, ndims=2))
    assert y_fast.shape == (2, 4, 256)
    np.testing.assert_allclose(np.asarray(y_fast), np.asarray(y_ref), rtol=0, atol=0)
    # Pallas identity-copy path.
    y_pl = jax.block_until_ready(merge_last_dims(x, ndims=2, force_pallas_copy=True))
    np.testing.assert_allclose(np.asarray(y_pl), np.asarray(y_ref), rtol=0, atol=0)

    # 2) ndims=1 (module default) is an identity view: (2, 8, 128) -> (2, 8, 128).
    x2 = jax.random.normal(jax.random.PRNGKey(1), (2, 8, 128), dtype=jnp.float32)
    y2 = jax.block_until_ready(merge_last_dims(x2, ndims=1, force_pallas_copy=True))
    assert y2.shape == (2, 8, 128)
    np.testing.assert_allclose(np.asarray(y2), np.asarray(x2), rtol=0, atol=0)

    # 3) Larger shape, exercises the full-width lane-dense slab: (64,8,32,32) -> (64,8,1024).
    x3 = jax.random.normal(jax.random.PRNGKey(2), (64, 8, 32, 32), dtype=jnp.float32)
    y3 = jax.block_until_ready(merge_last_dims(x3, ndims=2, force_pallas_copy=True))
    np.testing.assert_allclose(
        np.asarray(y3), np.asarray(jnp.reshape(x3, (64, 8, 1024))), rtol=0, atol=0
    )

    # 4) bf16 input, exercises the dtype-aware sublane multiple: (16,4,8,32) -> (16,4,256).
    x4 = jax.random.normal(jax.random.PRNGKey(3), (16, 4, 8, 32), dtype=jnp.bfloat16)
    y4 = jax.block_until_ready(merge_last_dims(x4, ndims=2, force_pallas_copy=True))
    np.testing.assert_array_equal(np.asarray(y4), np.asarray(jnp.reshape(x4, (16, 4, 256))))

    # 5) Shape whose total is not a multiple of 128, exercises the full-extent fallback.
    x5 = jax.random.normal(jax.random.PRNGKey(4), (2, 4, 5, 7), dtype=jnp.float32)
    y5 = jax.block_until_ready(merge_last_dims(x5, ndims=2, force_pallas_copy=True))
    np.testing.assert_allclose(
        np.asarray(y5), np.asarray(jnp.reshape(x5, (2, 4, 35))), rtol=0, atol=0
    )

    print("KERNEL_OK")
</pallas_src>

<mosaic_0001>
module attributes {stable_mosaic.version = 11 : i64} {
  func.func @_copy_kernel(%arg0: i32, %arg1: memref<1x2048xf32, #tpu.memory_space<vmem>>, %arg2: memref<1x2048xf32, #tpu.memory_space<vmem>>) attributes {dimension_semantics = [#tpu.dimension_semantics<parallel>], iteration_bounds = array<i64: 1>, scalar_prefetch = 0 : i64, scratch_operands = 0 : i64, tpu.core_type = #tpu.core_type<tc>, window_params = [{transform_indices = @transform_0, window_bounds = array<i64: 1, 2048>}, {transform_indices = @transform_1, window_bounds = array<i64: 1, 2048>}]} {
    %c0 = arith.constant 0 : index
    %c0_0 = arith.constant 0 : index
    %0 = vector.load %arg1[%c0, %c0_0] : memref<1x2048xf32, #tpu.memory_space<vmem>>, vector<1x2048xf32>
    %c0_1 = arith.constant 0 : index
    %c0_2 = arith.constant 0 : index
    %1 = vector.load %arg2[%c0_1, %c0_2] : memref<1x2048xf32, #tpu.memory_space<vmem>>, vector<1x2048xf32>
    tpu.vector_store %arg2[%c0_1, %c0_2], %0 {strides = array<i32>} : memref<1x2048xf32, #tpu.memory_space<vmem>>, vector<1x2048xf32>,
    return
  }
  func.func @transform_0(%arg0: i32) -> (i32, i32) {
    %c0_i32 = arith.constant 0 : i32
    %c0_i32_0 = arith.constant 0 : i32
    return %arg0, %c0_i32 : i32, i32
  }
  func.func @transform_1(%arg0: i32) -> (i32, i32) {
    %c0_i32 = arith.constant 0 : i32
    %c0_i32_0 = arith.constant 0 : i32
    return %arg0, %c0_i32 : i32, i32
  }
}

</mosaic_0001>

<bundles_post_ra>
// kernel: tpu_custom_call.1
= control target key start
LH: loop header
LB: loop body
LE: loop exit
PB: predicated region body
PF: predicated region fallthrough
CT: control target
= control target key end

     0   :  { %6 = vsyncpa [#allocation3], 0  ;;  %s104_s0 = inlined_call_operand.hbm [shape: f32[1,2048], index: 0, kind: input, shape index: {}]   ;;  %s105_s1 = inlined_call_operand.hbm [shape: f32[1,2048], index: 1, kind: output, shape index: {}]  }
   0x1   :  { %7 = vsyncpa [#allocation4], 0  ;;  %s86_s6 = smov [#allocation2]  }
   0x2   :  { %s14_s7 = sshll.u32 %s86_s6, 4  ;;  %s15_s7 = int_to_ptr.vmem [resolvable:$true] %s14_s7 }
   0x3   :  { %s50_s8 = scalar_lea.vmem %s15_s7, 256  ;;  %p55_p1 = scmp.lt.s32.totalorder %s15_s7, %s15_s7 }
   0x4   :  { %p51_p0 = scmp.ne.s32.totalorder %s15_s7, %s50_s8  ;;  %p56_p2 = scmp.lt.s32.totalorder %s50_s8, %s50_s8 }
   0x6   :  { %p57_p3 = por %p56_p2, %p55_p1 }
   0x8   :  { %p58_p4 = pnand %p57_p3, %p51_p0 }
   0xa   :  { %61 = shalt.err (!%p58_p4)
}
   0xb   :  { %17 = dma.hbm_to_vmem [thread:$0]  %s104_s0, 256, %s15_s7, [#allocation3]  }
   0xc   :  { %82 = dma.done.wait [#allocation3], 256  }
   0xd   :  { %83 = vsyncadd [#allocation3], 4294967040  ;;  %s87_s11 = smov [#allocation5]   ;;  %v21_v0 = vld [vmem:[#allocation2] sm:$0xff]  ;;  %v22_v1 = vld [vmem:[#allocation2 + $0x8] sm:$0xff] }
   0xe   :  { %s31_s12 = sshll.u32 %s87_s11, 4  ;;  %23 = vst [vmem:[#allocation5] sm:$0xff] %v21_v0  ;;  %24 = vst [vmem:[#allocation5 + $0x8] sm:$0xff] %v22_v1  ;;  %s32_s12 = int_to_ptr.vmem [resolvable:$true] %s31_s12 }
   0xf   :  { %s62_s13 = scalar_lea.vmem %s32_s12, 256  ;;  %p67_p6 = scmp.lt.s32.totalorder %s32_s12, %s32_s12 }
  0x10   :  { %p63_p5 = scmp.ne.s32.totalorder %s32_s12, %s62_s13  ;;  %p68_p7 = scmp.lt.s32.totalorder %s62_s13, %s62_s13 }
  0x12   :  { %p69_p8 = por %p68_p7, %p67_p6 }
  0x14   :  { %p70_p9 = pnand %p69_p8, %p63_p5 }
  0x16   :  { %73 = shalt.err (!%p70_p9)
}
  0x17   :  { %34 = dma.vmem_to_hbm [thread:$0]  %s32_s12, 256, %s105_s1, [#allocation4]  }
  0x18   :  { %84 = dma.done.wait [#allocation4], 256  }
  0x19   :  { %85 = vsyncadd [#allocation4], 4294967040 }
  0x1a   :  { %38 = vsyncpa [#allocation3], 1 }
  0x1b   :  { %39 = vsyncpa [#allocation4], 1 }

</bundles_post_ra>
